<compile_context>
chip_gen: v5e
topology: v5e:2x2
jax: 0.10.0
libtpu: 0.0.40
codegen_flags: <defaults>
</compile_context>

<pallas_src>
import jax
import jax.numpy as jnp
from jax import lax
from jax.experimental import pallas as pl
from jax.experimental.pallas import tpu as pltpu


def _round_up(x: int, m: int) -> int:
    return (x + m - 1) // m * m


def _make_speaker_embed_kernel(s_rem: int, needs_mask: bool, inv_s: float):
    """Build the kernel. s_rem / needs_mask / inv_s are static (closed over).

    s_rem: number of valid rows in the LAST sequence tile (== ts when the tile
    is full).  needs_mask: whether the last tile is ragged.
    """

    def kernel(x_ref, w_ref, b_ref, o_ref, acc_ref):
        # x_ref: (1, TS, H) input dtype   w_ref: (H, Dp) bf16   b_ref: (1, Dp) f32
        # o_ref: (1, 1, Dp) f32           acc_ref: (1, Dp) f32 scratch
        s_idx = pl.program_id(1)
        last = pl.num_programs(1) - 1

        @pl.when(s_idx == 0)
        def _init():
            acc_ref[...] = jnp.zeros_like(acc_ref)

        # Cast activations to bf16 in-kernel (no extra HBM round trip in the
        # wrapper); bf16 x bf16 -> f32 accumulate on the MXU.
        x = x_ref[0].astype(jnp.bfloat16)                       # (TS, H)
        y = jnp.dot(x, w_ref[...], preferred_element_type=jnp.float32)  # (TS, Dp)
        y = jnp.maximum(y + b_ref[...], 0.0)                    # bias + ReLU (VPU)

        if needs_mask:
            # Only the ragged last tile pays for the iota/compare/select;
            # its out-of-bounds rows are undefined and must be zeroed.
            @pl.when(s_idx == last)
            def _acc_masked():
                ts = y.shape[0]
                row = lax.broadcasted_iota(jnp.int32, (ts, 1), 0)
                ym = jnp.where(row < s_rem, y, 0.0)
                acc_ref[...] += jnp.sum(ym, axis=0, keepdims=True)

            @pl.when(s_idx != last)
            def _acc_full():
                acc_ref[...] += jnp.sum(y, axis=0, keepdims=True)
        else:
            acc_ref[...] += jnp.sum(y, axis=0, keepdims=True)

        @pl.when(s_idx == last)
        def _finalize():
            out = (acc_ref[...] * inv_s).astype(o_ref.dtype)
            o_ref[...] = out.reshape(o_ref.shape)

    return kernel


class InnerSpeakerModel:
    """Deterministic stand-in for the model wrapped by WrappedModel."""

    # VMEM budget for the ts-dependent buffers (double-buffered x tile + f32
    # intermediate).  Kept well under the smallest scoped limit we request.
    _VMEM_BUDGET = 24 * 1024 * 1024
    _VMEM_LIMIT = 32 * 1024 * 1024  # <= default scoped VMEM on v7x, < physical everywhere

    def __init__(self, hidden: int, emb_dim: int, tile_s: int | None = None):
        key = jax.random.PRNGKey(0)
        kw, kb = jax.random.split(key)
        self.hidden = hidden
        self.emb_dim = emb_dim
        self.tile_s = tile_s

        # f32 "master" parameters (kept for reference checks).
        self.weight = jax.random.normal(kw, (hidden, emb_dim), jnp.float32) * 0.05
        self.bias = jax.random.normal(kb, (1, emb_dim), jnp.float32) * 0.01

        # Only the OUTPUT dim is padded (to the next multiple of 128, not more)
        # so stores stay lane-dense; H is used unpadded (block last dim == full
        # array dim).  Weight padding is a one-time init cost.
        dp = _round_up(emb_dim, 128)
        self._dp = dp
        self._w_bf16 = (
            jnp.zeros((hidden, dp), jnp.bfloat16)
            .at[:, :emb_dim]
            .set(self.weight.astype(jnp.bfloat16))
        )
        self._b_f32 = jnp.zeros((1, dp), jnp.float32).at[:, :emb_dim].set(self.bias)

    def _pick_tile_s(self, S: int, x_itemsize: int) -> int:
        """Largest S-tile (multiple of 16) that fits the VMEM budget, <= 2048."""
        H, dp = self.hidden, self._dp
        fixed = 2 * H * dp * 2 + 4 * dp * 4 + 2 * dp * 4  # w (x2), bias/out/acc
        per_row = 2 * H * x_itemsize + dp * 4             # x double-buffer + f32 y
        cap = max(16, (self._VMEM_BUDGET - fixed) // per_row)
        ts = min(2048, _round_up(S, 16), cap)
        return max(16, (ts // 16) * 16)

    def __call__(self, x, label=None):
        B, S, H = x.shape
        assert H == self.hidden
        dp = self._dp

        if self.tile_s is not None:
            ts = max(16, _round_up(self.tile_s, 16))
        else:
            ts = self._pick_tile_s(S, x.dtype.itemsize)
        n_s = pl.cdiv(S, ts)
        s_rem = S - (n_s - 1) * ts          # valid rows in the last tile
        needs_mask = s_rem != ts            # static

        kernel = _make_speaker_embed_kernel(s_rem, needs_mask, 1.0 / S)

        out = pl.pallas_call(
            kernel,
            out_shape=jax.ShapeDtypeStruct((B, 1, dp), jnp.float32),
            grid_spec=pltpu.PrefetchScalarGridSpec(
                num_scalar_prefetch=0,
                grid=(B, n_s),
                in_specs=[
                    # x streamed directly from HBM in its producer dtype,
                    # unpadded H (last block dim == full array dim).
                    pl.BlockSpec((1, ts, H), lambda b, s: (b, s, 0)),
                    pl.BlockSpec((H, dp), lambda b, s: (0, 0)),
                    pl.BlockSpec((1, dp), lambda b, s: (0, 0)),
                ],
                out_specs=pl.BlockSpec((1, 1, dp), lambda b, s: (b, 0, 0)),
                scratch_shapes=[pltpu.VMEM((1, dp), jnp.float32)],
            ),
            compiler_params=pltpu.CompilerParams(
                dimension_semantics=("parallel", "arbitrary"),
                vmem_limit_bytes=self._VMEM_LIMIT,
            ),
        )(x, self._w_bf16, self._b_f32)

        # TODO(synk): a real wrapped SpeakerNet would consume `label` for a
        # loss; with label=None it returns the embedding, reproduced here.
        return out[:, 0, : self.emb_dim]


class WrappedModel:
    """Exact port of the PyTorch WrappedModel: pure pass-through wrapper."""

    def __init__(self, model):
        self.module = model

    def __call__(self, x, label=None):
        return self.module(x, label)

    # keep torch-like spelling available
    def forward(self, x, label=None):
        return self.__call__(x, label)


if __name__ == "__main__":
    # Small shapes: S=40 with tile_s=16 exercises the multi-tile S reduction
    # and the ragged last-tile masking path; H=32 / D=64 exercise the
    # unpadded-H input path and the lane-dense Dp=128 output padding.
    B, S, H, D = 2, 40, 32, 64
    key = jax.random.PRNGKey(0)
    x = jax.random.normal(key, (B, S, H), jnp.float32)

    model = WrappedModel(InnerSpeakerModel(hidden=H, emb_dim=D, tile_s=16))
    out = jax.block_until_ready(model(x, label=None))

    # Reference: same bf16 rounding of activations/weights, f32 math.
    xr = x.astype(jnp.bfloat16).astype(jnp.float32)
    wr = model.module.weight.astype(jnp.bfloat16).astype(jnp.float32)
    y = jnp.einsum("bsh,hd->bsd", xr, wr) + model.module.bias[None, :, :]
    ref = jnp.mean(jnp.maximum(y, 0.0), axis=1)

    assert out.shape == (B, D)
    assert jnp.allclose(out, ref, atol=1e-2, rtol=1e-2), float(
        jnp.max(jnp.abs(out - ref))
    )

    # Also exercise the default (large-tile, single-tile-covers-S) path.
    model2 = WrappedModel(InnerSpeakerModel(hidden=H, emb_dim=D))
    out2 = jax.block_until_ready(model2(x))
    assert jnp.allclose(out2, ref, atol=1e-2, rtol=1e-2)

    print("KERNEL_OK")
</pallas_src>

<mosaic_0001>
module attributes {stable_mosaic.version = 11 : i64} {
  func.func @kernel(%arg0: i32, %arg1: i32, %arg2: memref<1x16x32xf32, #tpu.memory_space<vmem>>, %arg3: memref<32x128xbf16, #tpu.memory_space<vmem>>, %arg4: memref<1x128xf32, #tpu.memory_space<vmem>>, %arg5: memref<1x1x128xf32, #tpu.memory_space<vmem>>, %arg6: memref<1x128xf32, #tpu.memory_space<vmem>>) attributes {dimension_semantics = [#tpu.dimension_semantics<parallel>, #tpu.dimension_semantics<arbitrary>], iteration_bounds = array<i64: 2, 3>, scalar_prefetch = 0 : i64, scratch_operands = 1 : i64, tpu.core_type = #tpu.core_type<tc>, window_params = [{transform_indices = @transform_0, window_bounds = array<i64: 1, 16, 32>}, {pipeline_mode = #tpu.pipeline_mode<synchronous>, transform_indices = @transform_1, window_bounds = array<i64: 32, 128>}, {pipeline_mode = #tpu.pipeline_mode<synchronous>, transform_indices = @transform_2, window_bounds = array<i64: 1, 128>}, {transform_indices = @transform_3, window_bounds = array<i64: 1, 1, 128>}]} {
    %c0_i32 = arith.constant 0 : i32
    %0 = arith.cmpi eq, %arg1, %c0_i32 : i32
    %1 = arith.extui %0 : i1 to i32
    %c0_i32_0 = arith.constant 0 : i32
    %2 = arith.cmpi ne, %1, %c0_i32_0 : i32
    scf.if %2 {
      %cst_13 = arith.constant 0.000000e+00 : f32
      %22 = vector.broadcast %cst_13 : f32 to vector<1x128xf32>
      %c0_14 = arith.constant 0 : index
      %c0_15 = arith.constant 0 : index
      %23 = vector.load %arg6[%c0_14, %c0_15] : memref<1x128xf32, #tpu.memory_space<vmem>>, vector<1x128xf32>
      tpu.vector_store %arg6[%c0_14, %c0_15], %22 {strides = array<i32>} : memref<1x128xf32, #tpu.memory_space<vmem>>, vector<1x128xf32>,
    } else {
    }
    %c0 = arith.constant 0 : index
    %c0_1 = arith.constant 0 : index
    %c0_2 = arith.constant 0 : index
    %3 = vector.load %arg2[%c0, %c0_1, %c0_2] : memref<1x16x32xf32, #tpu.memory_space<vmem>>, vector<1x16x32xf32>
    %4 = vector.shape_cast %3 : vector<1x16x32xf32> to vector<16x32xf32>
    %5 = arith.truncf %4 : vector<16x32xf32> to vector<16x32xbf16>
    %c0_3 = arith.constant 0 : index
    %c0_4 = arith.constant 0 : index
    %6 = vector.load %arg3[%c0_3, %c0_4] : memref<32x128xbf16, #tpu.memory_space<vmem>>, vector<32x128xbf16>
    %cst = arith.constant dense<0.000000e+00> : vector<16x128xf32>
    %7 = tpu.matmul %5, %6, %cst {dimension_numbers = #tpu.dot_dimension_numbers<[1], [0], [0], [1], [0, 0, 1, 1], [], []>} : vector<16x32xbf16>, vector<32x128xbf16>, vector<16x128xf32> -> vector<16x128xf32>
    %c0_5 = arith.constant 0 : index
    %c0_6 = arith.constant 0 : index
    %8 = vector.load %arg4[%c0_5, %c0_6] : memref<1x128xf32, #tpu.memory_space<vmem>>, vector<1x128xf32>
    %9 = vector.broadcast %8 : vector<1x128xf32> to vector<16x128xf32>
    %10 = arith.addf %7, %9 : vector<16x128xf32>
    %cst_7 = arith.constant 0.000000e+00 : f32
    %11 = vector.broadcast %cst_7 : f32 to vector<16x128xf32>
    %12 = arith.maximumf %10, %11 : vector<16x128xf32>
    %c2_i32 = arith.constant 2 : i32
    %13 = arith.cmpi eq, %arg1, %c2_i32 : i32
    %14 = arith.extui %13 : i1 to i32
    %c0_i32_8 = arith.constant 0 : i32
    %15 = arith.cmpi ne, %14, %c0_i32_8 : i32
    scf.if %15 {
      %22 = tpu.iota {dimensions = array<i32: 0>} : vector<16x1xi32>
      %c8_i32 = arith.constant 8 : i32
      %23 = vector.broadcast %c8_i32 : i32 to vector<16x1xi32>
      %24 = arith.cmpi slt, %22, %23 : vector<16x1xi32>
      %cst_13 = arith.constant 0.000000e+00 : f32
      %25 = vector.shape_cast %24 : vector<16x1xi1> to vector<16x1xi1>
      %26 = vector.broadcast %25 : vector<16x1xi1> to vector<16x128xi1>
      %27 = vector.broadcast %cst_13 : f32 to vector<16x128xf32>
      %28 = arith.select %26, %12, %27 : vector<16x128xi1>, vector<16x128xf32>
      %c0_14 = arith.constant 0 : index
      %c0_15 = arith.constant 0 : index
      %29 = vector.load %arg6[%c0_14, %c0_15] : memref<1x128xf32, #tpu.memory_space<vmem>>, vector<1x128xf32>
      %cst_16 = arith.constant dense<0.000000e+00> : vector<128xf32>
      %30 = vector.multi_reduction <add>, %28, %cst_16 [0] : vector<16x128xf32> to vector<128xf32>
      %31 = vector.shape_cast %30 : vector<128xf32> to vector<1x128xf32>
      %32 = arith.addf %29, %31 : vector<1x128xf32>
      %c0_17 = arith.constant 0 : index
      %c0_18 = arith.constant 0 : index
      %33 = vector.load %arg6[%c0_17, %c0_18] : memref<1x128xf32, #tpu.memory_space<vmem>>, vector<1x128xf32>
      tpu.vector_store %arg6[%c0_17, %c0_18], %32 {strides = array<i32>} : memref<1x128xf32, #tpu.memory_space<vmem>>, vector<1x128xf32>,
    } else {
    }
    %c2_i32_9 = arith.constant 2 : i32
    %16 = arith.cmpi ne, %arg1, %c2_i32_9 : i32
    %17 = arith.extui %16 : i1 to i32
    %c0_i32_10 = arith.constant 0 : i32
    %18 = arith.cmpi ne, %17, %c0_i32_10 : i32
    scf.if %18 {
      %c0_13 = arith.constant 0 : index
      %c0_14 = arith.constant 0 : index
      %22 = vector.load %arg6[%c0_13, %c0_14] : memref<1x128xf32, #tpu.memory_space<vmem>>, vector<1x128xf32>
      %cst_15 = arith.constant dense<0.000000e+00> : vector<128xf32>
      %23 = vector.multi_reduction <add>, %12, %cst_15 [0] : vector<16x128xf32> to vector<128xf32>
      %24 = vector.shape_cast %23 : vector<128xf32> to vector<1x128xf32>
      %25 = arith.addf %22, %24 : vector<1x128xf32>
      %c0_16 = arith.constant 0 : index
      %c0_17 = arith.constant 0 : index
      %26 = vector.load %arg6[%c0_16, %c0_17] : memref<1x128xf32, #tpu.memory_space<vmem>>, vector<1x128xf32>
      tpu.vector_store %arg6[%c0_16, %c0_17], %25 {strides = array<i32>} : memref<1x128xf32, #tpu.memory_space<vmem>>, vector<1x128xf32>,
    } else {
    }
    %c2_i32_11 = arith.constant 2 : i32
    %19 = arith.cmpi eq, %arg1, %c2_i32_11 : i32
    %20 = arith.extui %19 : i1 to i32
    %c0_i32_12 = arith.constant 0 : i32
    %21 = arith.cmpi ne, %20, %c0_i32_12 : i32
    scf.if %21 {
      %c0_13 = arith.constant 0 : index
      %c0_14 = arith.constant 0 : index
      %22 = vector.load %arg6[%c0_13, %c0_14] : memref<1x128xf32, #tpu.memory_space<vmem>>, vector<1x128xf32>
      %cst_15 = arith.constant 2.500000e-02 : f32
      %23 = vector.broadcast %cst_15 : f32 to vector<1x128xf32>
      %24 = arith.mulf %22, %23 : vector<1x128xf32>
      %25 = vector.shape_cast %24 : vector<1x128xf32> to vector<1x1x128xf32>
      %c0_16 = arith.constant 0 : index
      %c0_17 = arith.constant 0 : index
      %c0_18 = arith.constant 0 : index
      %26 = vector.load %arg5[%c0_16, %c0_17, %c0_18] : memref<1x1x128xf32, #tpu.memory_space<vmem>>, vector<1x1x128xf32>
      tpu.vector_store %arg5[%c0_16, %c0_17, %c0_18], %25 {strides = array<i32>} : memref<1x1x128xf32, #tpu.memory_space<vmem>>, vector<1x1x128xf32>,
    } else {
    }
    return
  }
  func.func @transform_0(%arg0: i32, %arg1: i32) -> (i32, i32, i32) {
    %c0_i32 = arith.constant 0 : i32
    %c0_i32_0 = arith.constant 0 : i32
    return %arg0, %arg1, %c0_i32 : i32, i32, i32
  }
  func.func @transform_1(%arg0: i32, %arg1: i32) -> (i32, i32) {
    %c0_i32 = arith.constant 0 : i32
    %c0_i32_0 = arith.constant 0 : i32
    %c0_i32_1 = arith.constant 0 : i32
    return %c0_i32, %c0_i32_0 : i32, i32
  }
  func.func @transform_2(%arg0: i32, %arg1: i32) -> (i32, i32) {
    %c0_i32 = arith.constant 0 : i32
    %c0_i32_0 = arith.constant 0 : i32
    %c0_i32_1 = arith.constant 0 : i32
    return %c0_i32, %c0_i32_0 : i32, i32
  }
  func.func @transform_3(%arg0: i32, %arg1: i32) -> (i32, i32, i32) {
    %c0_i32 = arith.constant 0 : i32
    %c0_i32_0 = arith.constant 0 : i32
    %c0_i32_1 = arith.constant 0 : i32
    return %arg0, %c0_i32, %c0_i32_0 : i32, i32, i32
  }
}

</mosaic_0001>

<bundles_post_ra>
// kernel: tpu_custom_call.1
= control target key start
LH: loop header
LB: loop body
LE: loop exit
PB: predicated region body
PF: predicated region fallthrough
CT: control target
= control target key end

     0   :  { %8 = vsyncpa [#allocation4], 0  ;;  %s752_s0 = inlined_call_operand.vmem [shape: f32[2,40,32], index: 0, kind: input, shape index: {}]   ;;  %s753_s1 = inlined_call_operand.vmem [shape: bf16[32,128], index: 1, kind: input, shape index: {}]   ;;  %s754_s2 = inlined_call_operand.vmem [shape: f32[1,128], index: 2, kind: input, shape index: {}]   ;;  %s755_s3 = inlined_call_operand.hbm [shape: f32[2,1,128], index: 3, kind: output, shape index: {}]  }
   0x1   :  { %10 = vsyncpa [#allocation4 + $0x1], 0  ;;  %s610_s12 = smov 0   ;;  %s612_s13 = smov 0  }
   0x2   :  { %s614_s14 = smov 0   ;;  %s616_s15 = smov 0  }
   0x3   :  { %s618_s16 = smov 0   ;;  %s620_s17 = smov 0  }
   0x4   :  { %s622_s18 = smov 0   ;;  %s624_s19 = smov 0  }
   0x5 LB: > { %s395_s20 = sadd.s32 4294967295, %s587_s19   ;;  %s396_s21 = sadd.s32 4294967294, %s587_s19   ;;  %s587_s19 = sphi %s624_s19, %s16_s19   ;;  %s583_s18 = sphi %s622_s18, %s764_s18   ;;  %s579_s17 = sphi %s620_s17, %s763_s17   ;;  %s575_s16 = sphi %s618_s16, %s762_s16   ;;  %s571_s15 = sphi %s616_s15, %s761_s15   ;;  %s567_s14 = sphi %s614_s14, %s760_s14   ;;  %s563_s13 = sphi %s612_s13, %s759_s13   ;;  %s559_s12 = sphi %s610_s12, %s758_s12  }
   0x6   : > { %s25_s22 = sadd.s32 1, %s579_s17  ;;  %s28_s23 = sadd.s32 1, %s583_s18 }
   0x7   : > { %p26_p0 = scmp.ge.s32.totalorder %s25_s22, 3  ;;  %p115_p1 = scmp.ne.s32.totalorder %s567_s14, %s563_s13 }
   0x8   : > { %p116_p2 = scmp.eq.s32.totalorder %s395_s20, 5  ;;  %p121_p4 = scmp.ne.s32.totalorder %s563_s13, %s559_s12 }
   0x9   : > { %s766_s22 = smov (%p26_p0, %s25_s22), 0  ;;  %s768_s23 = smov (!%p26_p0, %s28_s23), %s583_s18 }
   0xa   : > { %p659_p3 = por %p116_p2, %p115_p1  ;;  %p30_p5 = scmp.ge.s32.totalorder %s768_s23, 2 }
   0xb   : > { %p122_p6 = scmp.eq.s32.totalorder %s396_s21, 5  ;;  %p399_p7 = scmp.ge.s32.totalorder %s587_s19, 1 }
   0xc   : > { %p167_p8 = scmp.lt.s32.totalorder %s587_s19, 7  ;;  %s770_s23 = smov (%p30_p5, %s768_s23), 0 }
   0xd   : > { %p669_p9 = por %p122_p6, %p121_p4  ;;  %s102_s26 = ssub.s32 %s583_s18, %s770_s23 }
   0xe   : > { %p168_p10 = pnand %p399_p7, %p167_p8  ;;  %s105_s27 = sadd.s32 1, %s567_s14 }
   0xf   : > { %p103_p11 = scmp.eq.s32.totalorder %s102_s26, 0  ;;  %s196_s29 = sand.u32 (!%p168_p10), 1, %s563_s13  }
  0x10   : > { %171 = sbr.rel (%p168_p10) target bundleno = 239 (0xef), region = 32  ;;  %s400_s30 = sshll.u32 (!%p168_p10), %s571_s15, 1 }
  0x11   : > { %s677_s28 = scalar_select %p103_p11, %s567_s14, %s105_s27  }
  0x12   : > { %p203_p12 = scmp.lt.s32.totalorder (!%p168_p10), %s575_s16, 1  ;;  %p205_p13 = scmp.lt.s32.totalorder (!%p168_p10), %s400_s30, 4 }
  0x13   : > { %s688_s11 = scalar_lea.vmem (!%p168_p10), [#allocation3], %s196_s29  ;;  %p402_p0 = scmp.ne.s32.totalorder (!%p168_p10), %s571_s15, 0 }
  0x15   : > { %s204_s4 = scalar_select %p203_p12, %s575_s16, 1 }
  0x16   : > { %s772_s30 = smov (!%p205_p13, %s400_s30), 4 }
  0x17   : > { %s419_s5 = smul.u32 5, %s204_s4 }
  0x18   : > { %220 = sbr.rel (%p402_p0) target bundleno = 31 (0x1f), region = 36 }
  0x19   : > { %s208_s6 = sadd.s32 %s419_s5, %s772_s30 }
  0x1a   : > { %s401_s7 = sshll.u32 %s208_s6, 3 }
  0x1b   : > { %s210_s10 = scalar_lea.vmem %s752_s0, %s401_s7 }
  0x1d   : > { %v589_v0 = vmov 0.0  }
  0x1e   : > { %221 = vst [vmem:[#allocation2] sm:$0x1] %v589_v0 }
  0x1f PF: > { %v418_v1 = vld [vmem:[%s753_s1 + $0x8] sm:$0xff]  ;;  %v417_v2 = vld [vmem:[%s753_s1] sm:$0xff]  ;;  %vm245_vm0 = vcmask 261120   ;;  %p412_p1 = scmp.ne.s32.totalorder %s571_s15, 2 }
  0x20   : > { %255 = vmatpush.bf16.msra.mxu0 %v418_v1  ;;  %v222_v3 = vld [vmem:[%s210_s10] sm:$0xff]  ;;  %v223_v4 = vld [vmem:[%s210_s10 + $0x8] sm:$0xff] }
  0x21   : > { %v224_v5 = vpack.c.bf16 %v223_v4, %v222_v3  ;;  %v492_v6 = vld [vmem:[%s754_s2] ss:$0 sm:$0xff] }
  0x24   : > { %256 = vmatpush.bf16.msra.mxu0 %v417_v2 }
  0x27   : > { %411 = vmatmul.msk.bf16.vlgmr.msra.gmra.mxu0 %vm245_vm0, %v224_v5 }
  0xa4   : > { %v258_v7 = vpop.f32.mrf.mxu0 }
  0xa5   : > { %v259_v8 = vadd.f32 %v492_v6, %v258_v7 }
  0xa7   : > { %v263_v9 = vmax.f32 %v259_v8, 0.0 }
  0xab   : > { %268 = sbr.rel (%p412_p1) target bundleno = 191 (0xbf), region = 40 }
  0xac   : > { %v260_v10 = vpop.f32.mrf.mxu0 }
  0xad   : > { %v261_v11 = vadd.f32 %v492_v6, %v260_v10 }
  0xaf   : > { %v264_v12 = vmax.f32 %v261_v11, 0.0 }
  0xb0   : > { %v282_v13 = vrot.slane %v263_v9, 4  ;;  %v280_v18 = vld [vmem:[#allocation2] sm:$0x1] }
  0xb2   : > { %v283_v14 = vadd.f32 %v282_v13, %v263_v9 }
  0xb4   : > { %v284_v15 = vrot.slane %v283_v14, 2 }
  0xb6   : > { %v285_v16 = vadd.f32 %v284_v15, %v283_v14 }
  0xb8   : > { %v286_v17 = vrot.slane %v285_v16, 1 }
  0xba   : > { %v287_v19 = vadd.f32 %v286_v17, %v285_v16 }
  0xbc   : > { %v288_v20 = vadd.f32 %v287_v19, %v280_v18 }
  0xbe   : > { %289 = vst [vmem:[#allocation2] sm:$0x1] %v288_v20 }
  0xbf PF: > { %p413_p2 = scmp.eq.s32.totalorder %s571_s15, 2 }
  0xc1   : > { %293 = sbr.rel (%p413_p2) target bundleno = 215 (0xd7), region = 44 }
  0xc6   : > { %v295_v21 = vadd.f32 %v264_v12, %v263_v9  ;;  %v294_v27 = vld [vmem:[#allocation2] sm:$0x1] }
  0xc8   : > { %v296_v22 = vrot.slane %v295_v21, 4 }
  0xca   : > { %v297_v23 = vadd.f32 %v296_v22, %v295_v21 }
  0xcc   : > { %v298_v24 = vrot.slane %v297_v23, 2 }
  0xce   : > { %v299_v25 = vadd.f32 %v298_v24, %v297_v23 }
  0xd0   : > { %v300_v26 = vrot.slane %v299_v25, 1 }
  0xd2   : > { %v301_v28 = vadd.f32 %v300_v26, %v299_v25 }
  0xd4   : > { %v302_v29 = vadd.f32 %v301_v28, %v294_v27 }
  0xd6   : > { %303 = vst [vmem:[#allocation2] sm:$0x1] %v302_v29 }
  0xd7 PF: > { %306 = sbr.rel (%p412_p1) target bundleno = 225 (0xe1), region = 48 }
  0xdd   : > { %v307_v30 = vld [vmem:[#allocation2] sm:$0x1] }
  0xde   : > { %v308_v31 = vmul.f32 0.025, %v307_v30 }
  0xe0   : > { %309 = vst [vmem:[%s688_s11] sm:$0x1] %v308_v31 }
  0xe1 PF: > { %s319_s7 = scalar_lea.hbm %s755_s3, %s575_s16  ;;  %s321_s8 = sshll.u32 %s688_s11, 4  ;;  %s322_s8 = int_to_ptr.vmem [resolvable:$true] %s321_s8 }
  0xe2   : > { %s323_s9 = sshll.u32 %s319_s7, 4  ;;  %s311_s15 = scalar_lea.sflag [#allocation4], %s196_s29  ;;  %s324_s9 = int_to_ptr.hbm [resolvable:$true] %s323_s9 }
  0xe3   : > { %s507_s10 = sshra.s32 %s324_s9, 4  ;;  %s513_s27 = scalar_lea.hbm %s755_s3, 2  ;;  %s508_s10 = int_to_ptr.hbm [resolvable:$true] %s507_s10 }
  0xe4   : > { %s509_s20 = scalar_lea.hbm %s508_s10, 1  ;;  %p514_p7 = scmp.lt.s32.totalorder %s508_s10, %s755_s3 }
  0xe5   : > { %p510_p4 = scmp.ne.s32.totalorder %s508_s10, %s509_s20  ;;  %p515_p8 = scmp.lt.s32.totalorder %s513_s27, %s509_s20 }
  0xe7   : > { %p511_p5 = pnand %p510_p4, %p659_p3  ;;  %p516_p10 = por %p515_p8, %p514_p7 }
  0xe9   : > { %p512_p6 = pneg %p511_p5 }
  0xeb   : > { %p517_p11 = pnand %p516_p10, %p512_p6 }
  0xed   : > { %520 = shalt.err (!%p517_p11)
}
  0xee   : > { %420 = dma.vmem_to_hbm [thread:$0]  (%p659_p3), %s322_s8, 16, %s324_s9, %s311_s15  }
  0xef PF: > { %p426_p12 = scmp.ge.s32.totalorder %s587_s19, 2  ;;  %s335_s16 = sand.u32 1, %s559_s12  }
  0xf0   : > { %s336_s29 = scalar_lea.sflag [#allocation4], %s335_s16 }
  0xf1   : > { %p423_p13 = pnand %p426_p12, %p669_p9 }
  0xf3   : > { %p424_p0 = pneg %p423_p13 }
  0xf5   : > { %554 = dma.done.wait (%p424_p0), %s336_s29, 16  }
  0xf6   : > { %556 = vsyncadd (%p424_p0), %s336_s29, 4294967280  ;;  %s16_s19 = sadd.s32 1, %s587_s19   ;;  %s758_s12 = smov %s563_s13 }
  0xf7   : > { %p13_p1 = scmp.ge.s32.totalorder %s16_s19, 8   ;;  %s759_s13 = smov %s567_s14 }
  0xf8   : > { %s760_s14 = smov %s677_s28  ;;  %s761_s15 = smov %s579_s17 }
  0xf9   : > { %s762_s16 = smov %s583_s18  ;;  %s763_s17 = smov %s766_s22 }
  0xfa   : > { %s764_s18 = smov %s770_s23  ;;  %15 = sbr.rel (!%p13_p1) target bundleno = 5 (0x5), region = 83 }
  0xff   :  { %341 = vsyncpa [#allocation4], 1 }
 0x100   :  { %343 = vsyncpa [#allocation4 + $0x1], 1 }

</bundles_post_ra>
